<compile_context>
chip_gen: v7x
topology: tpu7x:2x2x1
jax: 0.10.0
libtpu: 0.0.40
codegen_flags: <defaults>
</compile_context>

<pallas_src>
import jax
import jax.numpy as jnp
from jax.experimental import pallas as pl
from jax.experimental.pallas import tpu as pltpu

H1, H2 = 400, 300          # logical hidden sizes (PyTorch module)
H1_PAD, H2_PAD = 512, 384  # lane-padded hidden sizes (multiples of 128)

_MIN_TILE = 16             # bf16 sublane packing -> >=16 rows per tile
_MAX_TILE = 2048           # v7x VMEM-safe cap (~9 MB intermediates/tile)


def _round_up(x, m):
    return ((x + m - 1) // m) * m


def _choose_tile(batch, max_tile=_MAX_TILE):
    """Tile sized from B: near-full last tile, >=2 steps when possible, capped."""
    nb_target = max(2, pl.cdiv(batch, max_tile))
    tb = _round_up(pl.cdiv(batch, nb_target), _MIN_TILE)
    tb = max(_MIN_TILE, min(tb, max_tile))
    return tb


def _critic_kernel(x_ref, w1_ref, b1_ref, w2_ref, b2_ref, w3_ref, b3_ref,
                   q_ref):
    """One batch tile of the full MLP: 2 MXU matmuls + VPU reduction head."""
    # encoder: Linear(obs+act, 512-padded) -> ReLU  (bf16 operands, f32 accum)
    h1 = jnp.dot(x_ref[...], w1_ref[...], preferred_element_type=jnp.float32)
    h1 = jnp.maximum(h1 + b1_ref[...], 0.0)

    # fc[0..1]: Linear(512, 384-padded) -> ReLU
    h2 = jnp.dot(h1.astype(jnp.bfloat16), w2_ref[...],
                 preferred_element_type=jnp.float32)
    h2 = jnp.maximum(h2 + b2_ref[...], 0.0)

    # fc[2]: Linear(384-padded, 1) as VPU multiply + lane reduction
    # (avoids a wasteful N=1 MXU matmul; XLU/VPU slots have slack).
    q = jnp.sum(h2 * w3_ref[...], axis=-1, keepdims=True) + b3_ref[0, 0]
    q_ref[...] = q.astype(q_ref.dtype)


def encoder1_critic_forward(state, action, params, *, max_block_b=_MAX_TILE):
    """Returns (q, q) just like the PyTorch module's forward."""
    B = state.shape[0]

    # Wrapper-side concat + bf16 cast (single merged layer-1 operand).
    x = jnp.concatenate([state, action], axis=1).astype(jnp.bfloat16)
    in_dim = x.shape[1]

    tb = _choose_tile(B, max_block_b)
    nb = pl.cdiv(B, tb)
    b_pad = nb * tb
    if b_pad != B:
        x = jnp.pad(x, ((0, b_pad - B), (0, 0)))

    w1, b1 = params["w1"], params["b1"]
    w2, b2 = params["w2"], params["b2"]
    w3, b3 = params["w3"], params["b3"]

    const_spec = lambda arr: pl.BlockSpec(arr.shape, lambda i: (0, 0))

    flops = 2 * b_pad * (in_dim * H1_PAD + H1_PAD * H2_PAD + H2_PAD)
    bytes_accessed = (
        x.size * x.dtype.itemsize
        + w1.size * w1.dtype.itemsize + b1.size * b1.dtype.itemsize
        + w2.size * w2.dtype.itemsize + b2.size * b2.dtype.itemsize
        + w3.size * w3.dtype.itemsize + b3.size * b3.dtype.itemsize
        + b_pad * 4)

    q = pl.pallas_call(
        _critic_kernel,
        out_shape=jax.ShapeDtypeStruct((b_pad, 1), jnp.float32),
        grid=(nb,),
        in_specs=[
            pl.BlockSpec((tb, in_dim), lambda i: (i, 0)),        # x tile
            const_spec(w1),                                      # VMEM-resident
            const_spec(b1),
            const_spec(w2),
            const_spec(b2),
            const_spec(w3),
            pl.BlockSpec(memory_space=pltpu.MemorySpace.SMEM),   # scalar b3
        ],
        out_specs=pl.BlockSpec((tb, 1), lambda i: (i, 0)),
        compiler_params=pltpu.CompilerParams(
            dimension_semantics=("parallel",)),
        cost_estimate=pl.CostEstimate(
            flops=flops, transcendentals=0, bytes_accessed=bytes_accessed),
    )(x, w1, b1, w2, b2, w3, b3)

    q = q[:B]
    return q, q


def init_params(key, obs_dims, act_dims):
    """PyTorch-style uniform(-1/sqrt(fan_in), +1/sqrt(fan_in)) init.

    Returns (kernel_params, raw_f32_params).

    Kernel storage layout:
      w1 (obs+act, 512) bf16, b1 (1, 512) f32
      w2 (512, 384)     bf16, b2 (1, 384) f32
      w3 (1, 384)       f32  (row vector for the VPU-reduction head)
      b3 (1, 1)         f32  (lives in SMEM)
    Hidden dims zero-padded 400->512, 300->384 (exact under ReLU).
    """
    in_dim = obs_dims + act_dims
    k1w, k1b, k2w, k2b, k3w, k3b = jax.random.split(key, 6)

    bnd = 1.0 / (in_dim ** 0.5)
    w1 = jax.random.uniform(k1w, (in_dim, H1), jnp.float32, -bnd, bnd)
    b1 = jax.random.uniform(k1b, (1, H1), jnp.float32, -bnd, bnd)

    bnd = 1.0 / (H1 ** 0.5)
    w2 = jax.random.uniform(k2w, (H1, H2), jnp.float32, -bnd, bnd)
    b2 = jax.random.uniform(k2b, (1, H2), jnp.float32, -bnd, bnd)

    bnd = 1.0 / (H2 ** 0.5)
    w3 = jax.random.uniform(k3w, (H2, 1), jnp.float32, -bnd, bnd)
    b3 = jax.random.uniform(k3b, (1, 1), jnp.float32, -bnd, bnd)

    raw = {"w1": w1, "b1": b1, "w2": w2, "b2": b2, "w3": w3, "b3": b3}

    # zero-pad hidden dims to lane multiples (exact: ReLU(0)=0, zero weights)
    w1p = jnp.pad(w1, ((0, 0), (0, H1_PAD - H1)))
    b1p = jnp.pad(b1, ((0, 0), (0, H1_PAD - H1)))
    w2p = jnp.pad(w2, ((0, H1_PAD - H1), (0, H2_PAD - H2)))
    b2p = jnp.pad(b2, ((0, 0), (0, H2_PAD - H2)))
    w3p = jnp.pad(w3, ((0, H2_PAD - H2), (0, 0)))

    params = {
        "w1": w1p.astype(jnp.bfloat16),
        "b1": b1p,
        "w2": w2p.astype(jnp.bfloat16),
        "b2": b2p,
        "w3": jnp.transpose(w3p),   # (1, H2_PAD), f32
        "b3": b3,                   # (1, 1), f32
    }
    return params, raw


def _reference_forward_bf16(state, action, p):
    """Pure-JAX reference mirroring the kernel math (bf16 operands, f32 accum)."""
    x = jnp.concatenate([state, action], axis=1).astype(jnp.bfloat16)
    h1 = jnp.dot(x, p["w1"], preferred_element_type=jnp.float32)
    h1 = jnp.maximum(h1 + p["b1"], 0.0)
    h2 = jnp.dot(h1.astype(jnp.bfloat16), p["w2"],
                 preferred_element_type=jnp.float32)
    h2 = jnp.maximum(h2 + p["b2"], 0.0)
    return jnp.sum(h2 * p["w3"], axis=-1, keepdims=True) + p["b3"]


def _reference_forward_f32(state, action, raw):
    """Full-precision reference matching the PyTorch module's f32 math."""
    x = jnp.concatenate([state, action], axis=1)
    h1 = jnp.maximum(x @ raw["w1"] + raw["b1"], 0.0)
    h2 = jnp.maximum(h1 @ raw["w2"] + raw["b2"], 0.0)
    return h2 @ raw["w3"] + raw["b3"]


if __name__ == "__main__":
    obs_dims, act_dims, batch = 16, 4, 2

    key = jax.random.PRNGKey(0)
    key, ks, ka, kp = jax.random.split(key, 4)

    state = jax.random.normal(ks, (batch, obs_dims), jnp.float32)
    action = jax.random.normal(ka, (batch, act_dims), jnp.float32)
    params, raw = init_params(kp, obs_dims, act_dims)

    q1, q2 = encoder1_critic_forward(state, action, params)
    q1 = jax.block_until_ready(q1)
    q2 = jax.block_until_ready(q2)

    assert q1.shape == (batch, 1) and q2.shape == (batch, 1)
    assert jnp.array_equal(q1, q2)

    # Tight check vs a JAX reference using the same bf16 operand path.
    q_bf16 = _reference_forward_bf16(state, action, params)
    assert jnp.allclose(q1, q_bf16, atol=1e-3, rtol=1e-3), \
        "mismatch vs bf16-path reference"

    # Looser check vs the full f32 PyTorch-equivalent math (bf16 weight cast
    # is the documented precision tradeoff of this kernel).
    q_f32 = _reference_forward_f32(state, action, raw)
    assert jnp.allclose(q1, q_f32, atol=2e-2, rtol=2e-2), \
        "mismatch vs f32 reference beyond bf16 tolerance"

    print("KERNEL_OK")
</pallas_src>

<mosaic_0001>
module attributes {stable_mosaic.version = 11 : i64} {
  func.func @_critic_kernel(%arg0: i32, %arg1: memref<16x20xbf16, #tpu.memory_space<vmem>>, %arg2: memref<20x512xbf16, #tpu.memory_space<vmem>>, %arg3: memref<1x512xf32, #tpu.memory_space<vmem>>, %arg4: memref<512x384xbf16, #tpu.memory_space<vmem>>, %arg5: memref<1x384xf32, #tpu.memory_space<vmem>>, %arg6: memref<1x384xf32, #tpu.memory_space<vmem>>, %arg7: memref<1x1xf32, #tpu.memory_space<smem>>, %arg8: memref<16x1xf32, #tpu.memory_space<vmem>>) attributes {dimension_semantics = [#tpu.dimension_semantics<parallel>], iteration_bounds = array<i64: 1>, scalar_prefetch = 0 : i64, scratch_operands = 0 : i64, tpu.core_type = #tpu.core_type<tc>, window_params = [{transform_indices = @transform_0, window_bounds = array<i64: 16, 20>}, {pipeline_mode = #tpu.pipeline_mode<synchronous>, transform_indices = @transform_1, window_bounds = array<i64: 20, 512>}, {pipeline_mode = #tpu.pipeline_mode<synchronous>, transform_indices = @transform_2, window_bounds = array<i64: 1, 512>}, {pipeline_mode = #tpu.pipeline_mode<synchronous>, transform_indices = @transform_3, window_bounds = array<i64: 512, 384>}, {pipeline_mode = #tpu.pipeline_mode<synchronous>, transform_indices = @transform_4, window_bounds = array<i64: 1, 384>}, {pipeline_mode = #tpu.pipeline_mode<synchronous>, transform_indices = @transform_5, window_bounds = array<i64: 1, 384>}, {transform_indices = @transform_6, window_bounds = array<i64: 1, 1>}, {transform_indices = @transform_7, window_bounds = array<i64: 16, 1>}]} {
    %c0 = arith.constant 0 : index
    %c0_0 = arith.constant 0 : index
    %0 = vector.load %arg1[%c0, %c0_0] : memref<16x20xbf16, #tpu.memory_space<vmem>>, vector<16x20xbf16>
    %c0_1 = arith.constant 0 : index
    %c0_2 = arith.constant 0 : index
    %1 = vector.load %arg2[%c0_1, %c0_2] : memref<20x512xbf16, #tpu.memory_space<vmem>>, vector<20x512xbf16>
    %cst = arith.constant dense<0.000000e+00> : vector<16x512xf32>
    %2 = tpu.matmul %0, %1, %cst {dimension_numbers = #tpu.dot_dimension_numbers<[1], [0], [0], [1], [0, 0, 1, 1], [], []>} : vector<16x20xbf16>, vector<20x512xbf16>, vector<16x512xf32> -> vector<16x512xf32>
    %c0_3 = arith.constant 0 : index
    %c0_4 = arith.constant 0 : index
    %3 = vector.load %arg3[%c0_3, %c0_4] : memref<1x512xf32, #tpu.memory_space<vmem>>, vector<1x512xf32>
    %4 = vector.broadcast %3 : vector<1x512xf32> to vector<16x512xf32>
    %5 = arith.addf %2, %4 : vector<16x512xf32>
    %cst_5 = arith.constant 0.000000e+00 : f32
    %6 = vector.broadcast %cst_5 : f32 to vector<16x512xf32>
    %7 = arith.maximumf %5, %6 : vector<16x512xf32>
    %8 = arith.truncf %7 : vector<16x512xf32> to vector<16x512xbf16>
    %c0_6 = arith.constant 0 : index
    %c0_7 = arith.constant 0 : index
    %9 = vector.load %arg4[%c0_6, %c0_7] : memref<512x384xbf16, #tpu.memory_space<vmem>>, vector<512x384xbf16>
    %cst_8 = arith.constant dense<0.000000e+00> : vector<16x384xf32>
    %10 = tpu.matmul %8, %9, %cst_8 {dimension_numbers = #tpu.dot_dimension_numbers<[1], [0], [0], [1], [0, 0, 1, 1], [], []>} : vector<16x512xbf16>, vector<512x384xbf16>, vector<16x384xf32> -> vector<16x384xf32>
    %c0_9 = arith.constant 0 : index
    %c0_10 = arith.constant 0 : index
    %11 = vector.load %arg5[%c0_9, %c0_10] : memref<1x384xf32, #tpu.memory_space<vmem>>, vector<1x384xf32>
    %12 = vector.broadcast %11 : vector<1x384xf32> to vector<16x384xf32>
    %13 = arith.addf %10, %12 : vector<16x384xf32>
    %cst_11 = arith.constant 0.000000e+00 : f32
    %14 = vector.broadcast %cst_11 : f32 to vector<16x384xf32>
    %15 = arith.maximumf %13, %14 : vector<16x384xf32>
    %c0_12 = arith.constant 0 : index
    %c0_13 = arith.constant 0 : index
    %16 = vector.load %arg6[%c0_12, %c0_13] : memref<1x384xf32, #tpu.memory_space<vmem>>, vector<1x384xf32>
    %17 = vector.broadcast %16 : vector<1x384xf32> to vector<16x384xf32>
    %18 = arith.mulf %15, %17 : vector<16x384xf32>
    %cst_14 = arith.constant dense<0.000000e+00> : vector<16xf32>
    %19 = vector.multi_reduction <add>, %18, %cst_14 [1] : vector<16x384xf32> to vector<16xf32>
    %20 = vector.shape_cast %19 : vector<16xf32> to vector<16x1xf32>
    %c0_15 = arith.constant 0 : index
    %c0_16 = arith.constant 0 : index
    %21 = memref.load %arg7[%c0_15, %c0_16] : memref<1x1xf32, #tpu.memory_space<smem>>
    %22 = vector.broadcast %21 : f32 to vector<16x1xf32>
    %23 = arith.addf %20, %22 : vector<16x1xf32>
    %c0_17 = arith.constant 0 : index
    %c0_18 = arith.constant 0 : index
    %24 = vector.load %arg8[%c0_17, %c0_18] : memref<16x1xf32, #tpu.memory_space<vmem>>, vector<16x1xf32>
    tpu.vector_store %arg8[%c0_17, %c0_18], %23 {strides = array<i32>} : memref<16x1xf32, #tpu.memory_space<vmem>>, vector<16x1xf32>,
    return
  }
  func.func @transform_0(%arg0: i32) -> (i32, i32) {
    %c0_i32 = arith.constant 0 : i32
    %c0_i32_0 = arith.constant 0 : i32
    return %arg0, %c0_i32 : i32, i32
  }
  func.func @transform_1(%arg0: i32) -> (i32, i32) {
    %c0_i32 = arith.constant 0 : i32
    %c0_i32_0 = arith.constant 0 : i32
    %c0_i32_1 = arith.constant 0 : i32
    return %c0_i32, %c0_i32_0 : i32, i32
  }
  func.func @transform_2(%arg0: i32) -> (i32, i32) {
    %c0_i32 = arith.constant 0 : i32
    %c0_i32_0 = arith.constant 0 : i32
    %c0_i32_1 = arith.constant 0 : i32
    return %c0_i32, %c0_i32_0 : i32, i32
  }
  func.func @transform_3(%arg0: i32) -> (i32, i32) {
    %c0_i32 = arith.constant 0 : i32
    %c0_i32_0 = arith.constant 0 : i32
    %c0_i32_1 = arith.constant 0 : i32
    return %c0_i32, %c0_i32_0 : i32, i32
  }
  func.func @transform_4(%arg0: i32) -> (i32, i32) {
    %c0_i32 = arith.constant 0 : i32
    %c0_i32_0 = arith.constant 0 : i32
    %c0_i32_1 = arith.constant 0 : i32
    return %c0_i32, %c0_i32_0 : i32, i32
  }
  func.func @transform_5(%arg0: i32) -> (i32, i32) {
    %c0_i32 = arith.constant 0 : i32
    %c0_i32_0 = arith.constant 0 : i32
    %c0_i32_1 = arith.constant 0 : i32
    return %c0_i32, %c0_i32_0 : i32, i32
  }
  func.func @transform_6(%arg0: i32) -> (i32, i32) {
    %c0_i32 = arith.constant 0 : i32
    %c0_i32_0 = arith.constant 0 : i32
    %c0_i32_1 = arith.constant 0 : i32
    return %c0_i32, %c0_i32_0 : i32, i32
  }
  func.func @transform_7(%arg0: i32) -> (i32, i32) {
    %c0_i32 = arith.constant 0 : i32
    %c0_i32_0 = arith.constant 0 : i32
    return %arg0, %c0_i32 : i32, i32
  }
}

</mosaic_0001>

<bundles_post_ra>
// kernel: tpu_custom_call.1
= control target key start
LH: loop header
LB: loop body
LE: loop exit
PB: predicated region body
PF: predicated region fallthrough
CT: control target
= control target key end

     0   :  { %13 = vsyncpa [#allocation4], 0  ;;  %s1633_s0 = inlined_call_operand.hbm [shape: bf16[16,20], index: 0, kind: input, shape index: {}]   ;;  %s1634_s1 = inlined_call_operand.hbm [shape: bf16[20,512], index: 1, kind: input, shape index: {}]   ;;  %s1635_s2 = inlined_call_operand.vmem [shape: f32[1,512], index: 2, kind: input, shape index: {}]   ;;  %s1636_s3 = inlined_call_operand.hbm [shape: bf16[512,384], index: 3, kind: input, shape index: {}]   ;;  %s1637_s4 = inlined_call_operand.vmem [shape: f32[1,384], index: 4, kind: input, shape index: {}]   ;;  %s1638_s5 = inlined_call_operand.vmem [shape: f32[1,384], index: 5, kind: input, shape index: {}]   ;;  %s1639_s6 = inlined_call_operand.<no memory space> [shape: f32[1,1], index: 6, kind: input, shape index: {}]   ;;  %s1640_s7 = inlined_call_operand.vmem [shape: f32[16,1], index: 7, kind: output, shape index: {}]  }
   0x1   :  { %14 = vsyncpa [#allocation6], 0  ;;  %s1504_s24 = smov [#allocation5]   ;;  %s1434_s28 = scalar_lea.hbm %s1634_s1, 768 }
   0x2   :  { %s32_s25 = sshll.u32 %s1504_s24, 4  ;;  %p1435_p0 = scmp.ne.s32.totalorder %s1634_s1, %s1434_s28  ;;  %s33_s25 = int_to_ptr.vmem [resolvable:$true] %s32_s25 }
   0x3   :  { %p1438_p1 = scmp.lt.u32.totalorder %s1434_s28, %s1634_s1 }
   0x5   :  { %p1440_p2 = pnand %p1438_p1, %p1435_p0 }
   0x7   :  { %1443 = shalt.err (!%p1440_p2)
}
   0x8   :  { %s1444_s10 = scalar_lea.vmem %s33_s25, 768  ;;  %p1449_p4 = scmp.lt.s32.totalorder %s33_s25, %s33_s25 }
   0x9   :  { %p1445_p3 = scmp.ne.s32.totalorder %s33_s25, %s1444_s10  ;;  %p1450_p5 = scmp.lt.s32.totalorder %s1444_s10, %s1444_s10 }
   0xb   :  { %p1451_p6 = por %p1450_p5, %p1449_p4 }
   0xd   :  { %p1452_p7 = pnand %p1451_p6, %p1445_p3 }
   0xf   :  { %1455 = shalt.err (!%p1452_p7)
}
  0x10   :  { %s1505_s11 = smov 256   ;;  %s1506_s12 = smov 16  }
  0x11   :  { %38 = dma.hbm_to_vmem [thread:$0]  %s1634_s1, 768, %s33_s25, [#allocation6], %s1505_s11, %s1505_s11, %s1506_s12  }
  0x12   :  { %s1507_s15 = smov [#allocation3]   ;;  %s1456_s19 = scalar_lea.hbm %s1633_s0, 128 }
  0x13   :  { %s20_s16 = sshll.u32 %s1507_s15, 4  ;;  %p1457_p8 = scmp.ne.s32.totalorder %s1633_s0, %s1456_s19  ;;  %s21_s16 = int_to_ptr.vmem [resolvable:$true] %s20_s16 }
  0x14   :  { %p1460_p9 = scmp.lt.u32.totalorder %s1456_s19, %s1633_s0 }
  0x16   :  { %p1462_p10 = pnand %p1460_p9, %p1457_p8 }
  0x18   :  { %1465 = shalt.err (!%p1462_p10)
}
  0x19   :  { %s1466_s24 = scalar_lea.vmem %s21_s16, 128  ;;  %p1471_p12 = scmp.lt.s32.totalorder %s21_s16, %s21_s16 }
  0x1a   :  { %p1467_p11 = scmp.ne.s32.totalorder %s21_s16, %s1466_s24  ;;  %p1472_p13 = scmp.lt.s32.totalorder %s1466_s24, %s1466_s24 }
  0x1c   :  { %p1473_p0 = por %p1472_p13, %p1471_p12 }
  0x1e   :  { %p1474_p1 = pnand %p1473_p0, %p1467_p11 }
  0x20   :  { %1477 = shalt.err (!%p1474_p1)
}
  0x21   :  { %s1508_s1 = smov 64   ;;  %s1509_s25 = smov 4  }
  0x22   :  { %26 = dma.hbm_to_vmem [thread:$0]  %s1633_s0, 128, %s21_s16, [#allocation4], %s1508_s1, %s1508_s1, %s1509_s25  }
  0x23   :  { %s1510_s28 = smov [#allocation7]   ;;  %s1478_s9 = scalar_lea.hbm %s1636_s3, 12288 }
  0x24   :  { %s46_s29 = sshll.u32 %s1510_s28, 4  ;;  %p1479_p2 = scmp.ne.s32.totalorder %s1636_s3, %s1478_s9  ;;  %s47_s29 = int_to_ptr.vmem [resolvable:$true] %s46_s29 }
  0x25   :  { %p1482_p3 = scmp.lt.u32.totalorder %s1478_s9, %s1636_s3 }
  0x27   :  { %p1484_p4 = pnand %p1482_p3, %p1479_p2 }
  0x29   :  { %1487 = shalt.err (!%p1484_p4)
}
  0x2a   :  { %s1488_s14 = scalar_lea.vmem %s47_s29, 12288  ;;  %p1493_p6 = scmp.lt.s32.totalorder %s47_s29, %s47_s29 }
  0x2b   :  { %p1489_p5 = scmp.ne.s32.totalorder %s47_s29, %s1488_s14  ;;  %p1494_p7 = scmp.lt.s32.totalorder %s1488_s14, %s1488_s14 }
  0x2d   :  { %p1495_p8 = por %p1494_p7, %p1493_p6 }
  0x2f   :  { %p1496_p9 = pnand %p1495_p8, %p1489_p5 }
  0x31   :  { %1499 = shalt.err (!%p1496_p9)
}
  0x32   :  { %s1511_s0 = smov 192   ;;  %s1512_s15 = smov 12  }
  0x33   :  { %52 = dma.hbm_to_vmem [thread:$0]  %s1636_s3, 12288, %s47_s29, [#allocation6], %s1511_s0, %s1511_s0, %s1512_s15  }
  0x34   :  { %1500 = dma.done.wait [#allocation4], 128  }
  0x35   :  { %1501 = vsyncadd [#allocation4], 4294967168 }
  0x36   :  { %1502 = dma.done.wait [#allocation6], 13056  }
  0x37   :  { %1503 = vsyncadd [#allocation6], 4294954240  ;;  %v1513_v0 = vmov 0   ;;  %v1295_v1 = vld [vmem:[#allocation5 + $0x4] ss:$16 sps:$4 sm:$0xff]   ;;  %vm138_vm0 = vcmask 1041408  }
  0x38   :  { %183 = vmatprep.mubr.bf16.mxu1 %v1513_v0  ;;  %v1297_v2 = vld [vmem:[#allocation5] ss:$16 sps:$4 sm:$0xff]   ;;  %151 = vmatprep.subr.bf16.mxu1 %v1295_v1  ;;  %v1303_v6 = vld [vmem:[#allocation5 + $0xc] ss:$16 sps:$4 sm:$0xff]   ;;  %vm134_vm1 = vcmask 162816   ;;  %vm1115_vm2 = vcmask 7168  }
  0x39   :  { %v75_v3 = vld [vmem:[#allocation5 + $0x20] sm:$0x33]  ;;  %152 = vmatpush1.bf16.msra.mxu1 %v1297_v2  ;;  %v76_v8 = vld [vmem:[#allocation5 + $0x28] sm:$0x33]  ;;  %v1308_v10 = vld [vmem:[#allocation7] ss:$12 sps:$4 sm:$0xff]  }
  0x3a   :  { %v1130_v4 = vcombine.high %v75_v3, %v75_v3  ;;  %v1129_v5 = vcombine.low %v75_v3, %v75_v3  ;;  %v1306_v9 = vld [vmem:[#allocation7 + $0x4] ss:$12 sps:$4 sm:$0xff]   ;;  %v1300_v11 = vld [vmem:[#allocation3] sm:$0xff]   ;;  %v1132_v14 = vcombine.high %v76_v8, %v76_v8  ;;  %v1131_v15 = vcombine.low %v76_v8, %v76_v8  ;;  %v1312_v17 = vld [vmem:[#allocation7 + $0x34] ss:$12 sps:$4 sm:$0xff]  }
  0x3b   :  { %v1309_v12 = vld [vmem:[#allocation7 + $0x1c] ss:$12 sps:$4 sm:$0xff]   ;;  %906 = vmatprep.subr.bf16.mxu0 %v1306_v9  ;;  %v1311_v16 = vld [vmem:[#allocation7 + $0x18] ss:$12 sps:$4 sm:$0xff]   ;;  %v1320_v25 = vld [vmem:[#allocation7 + $0x60] ss:$12 sps:$4 sm:$0xff]  }
  0x3c   :  { %1133 = vmatprep.subr.msk.bf16.mxu1 %vm138_vm0, %v1130_v4  ;;  %v140_v7 = vsel %vm138_vm0, %v1129_v5, 0  ;;  %v1301_v13 = vld [vmem:[#allocation5 + $0x8] ss:$16 sps:$4 sm:$0xff]   ;;  %907 = vmatpush1.bf16.msra.mxu0 %v1308_v10  ;;  %v146_v18 = vsel %vm138_vm0, %v1131_v15, 0  ;;  %v1314_v19 = vld [vmem:[#allocation7 + $0x30] ss:$12 sps:$4 sm:$0xff]  }
  0x3d   :  { %154 = vmatpush1.bf16.msra.mxu1 %v140_v7  ;;  %908 = vmatprep.subr.bf16.mxu0 %v1309_v12  ;;  %v1315_v20 = vld [vmem:[#allocation7 + $0x4c] ss:$12 sps:$4 sm:$0xff]   ;;  %v1317_v21 = vld [vmem:[#allocation7 + $0x48] ss:$12 sps:$4 sm:$0xff]   ;;  %v1318_v23 = vld [vmem:[#allocation7 + $0x64] ss:$12 sps:$4 sm:$0xff]  }
  0x3e   :  { %194 = vmatprep.subr.bf16.mxu1 %v1303_v6  ;;  %v1332_v22 = vld [vmem:[#allocation7 + $0xc8] ss:$12 sps:$4 sm:$0xff]   ;;  %v1337_v27 = vld [vmem:[#allocation7 + $0xe0] ss:$12 sps:$4 sm:$0xff]   ;;  %v1323_v29 = vld [vmem:[#allocation7 + $0x78] ss:$12 sps:$4 sm:$0xff]  }
  0x3f   :  { %v1334_v24 = vld [vmem:[#allocation7 + $0x8] ss:$12 sps:$4 sm:$0xff]   ;;  %v1339_v28 = vld [vmem:[#allocation7 + $0x20] ss:$12 sps:$4 sm:$0xff]   ;;  %v1342_v30 = vld [vmem:[#allocation7 + $0xf8] ss:$12 sps:$4 sm:$0xff]  }
  0x40   :  { %1134 = vmatmul.mubr.msk.bf16.vlgmr.msra.gmra.mrb[0].mxu1 %vm134_vm1, %v1300_v11  ;;  %909 = vmatpush1.bf16.msra.mxu0 %v1311_v16  ;;  %v1321_v26 = vld [vmem:[#allocation7 + $0x7c] ss:$12 sps:$4 sm:$0xff]   ;;  %v1344_v31 = vld [vmem:[#allocation7 + $0x38] ss:$12 sps:$4 sm:$0xff]   ;;  %v1324_v32 = vld [vmem:[#allocation7 + $0x94] ss:$12 sps:$4 sm:$0xff]  }
  0x41   :  { %195 = vmatpush1.bf16.msra.mxu1 %v1301_v13  ;;  %226 = vmatprep.mubr.bf16.mxu1 %v1513_v0  ;;  %v1347_v33 = vld [vmem:[#allocation7 + $0x110] ss:$12 sps:$4 sm:$0xff]   ;;  %v1327_v36 = vld [vmem:[#allocation7 + $0xac] ss:$12 sps:$4 sm:$0xff]   ;;  %v1352_v37 = vld [vmem:[#allocation7 + $0x128] ss:$12 sps:$4 sm:$0xff]   ;;  %v79_v0 = vlaneseq }
  0x42   :  { %1135 = vmatprep.subr.msk.bf16.mxu1 %vm138_vm0, %v1132_v14  ;;  %910 = vmatprep.subr.bf16.mxu0 %v1312_v17  ;;  %v1326_v34 = vld [vmem:[#allocation7 + $0x90] ss:$12 sps:$4 sm:$0xff]   ;;  %v1329_v38 = vld [vmem:[#allocation7 + $0xa8] ss:$12 sps:$4 sm:$0xff]   ;;  %v1357_v41 = vld [vmem:[#allocation7 + $0x140] ss:$12 sps:$4 sm:$0xff]  }
  0x43   :  { %v1349_v35 = vld [vmem:[#allocation7 + $0x50] ss:$12 sps:$4 sm:$0xff]   ;;  %v1354_v39 = vld [vmem:[#allocation7 + $0x68] ss:$12 sps:$4 sm:$0xff]   ;;  %v1333_v42 = vld [vmem:[#allocation7 + $0xc0] ss:$12 sps:$4 sm:$0xff]  }
  0x44   :  { %911 = vmatpush1.bf16.msra.mxu0 %v1314_v19  ;;  %v1330_v40 = vld [vmem:[#allocation7 + $0xc4] ss:$12 sps:$4 sm:$0xff]   ;;  %v1335_v43 = vld [vmem:[#allocation7 + $0xdc] ss:$12 sps:$4 sm:$0xff]   ;;  %v1359_v44 = vld [vmem:[#allocation7 + $0x80] ss:$12 sps:$4 sm:$0xff]  }
  0x45   :  { %197 = vmatpush1.bf16.msra.mxu1 %v146_v18  ;;  %912 = vmatprep.subr.bf16.mxu0 %v1315_v20  ;;  %v1338_v45 = vld [vmem:[#allocation7 + $0xd8] ss:$12 sps:$4 sm:$0xff]   ;;  %v1340_v46 = vld [vmem:[#allocation7 + $0xf4] ss:$12 sps:$4 sm:$0xff]   ;;  %v1343_v47 = vld [vmem:[#allocation7 + $0xf0] ss:$12 sps:$4 sm:$0xff]  }
  0x46   :  { %1233 = vmatprep.subr.bf16.mxu1 %v1332_v22  ;;  %v1345_v48 = vld [vmem:[#allocation7 + $0x10c] ss:$12 sps:$4 sm:$0xff]   ;;  %v1348_v49 = vld [vmem:[#allocation7 + $0x108] ss:$12 sps:$4 sm:$0xff]   ;;  %v1350_v50 = vld [vmem:[#allocation7 + $0x124] ss:$12 sps:$4 sm:$0xff]  }
  0x47   :  { %v1353_v51 = vld [vmem:[#allocation7 + $0x120] ss:$12 sps:$4 sm:$0xff]   ;;  %v1355_v52 = vld [vmem:[#allocation7 + $0x13c] ss:$12 sps:$4 sm:$0xff]   ;;  %v1358_v53 = vld [vmem:[#allocation7 + $0x138] ss:$12 sps:$4 sm:$0xff]  }
  0x48   :  { %1136 = vmatmul.mubr.msk.bf16.vlgmr.msra.gmra.mrb[4].mxu1 %vm134_vm1, %v1300_v11  ;;  %913 = vmatpush1.bf16.msra.mxu0 %v1317_v21  ;;  %v1360_v54 = vld [vmem:[#allocation7 + $0x154] ss:$12 sps:$4 sm:$0xff]   ;;  %v1362_v55 = vld [vmem:[#allocation7 + $0x158] ss:$12 sps:$4 sm:$0xff]   ;;  %v1363_v56 = vld [vmem:[#allocation7 + $0x150] ss:$12 sps:$4 sm:$0xff]  }
  0x49   :  { %1234 = vmatpush3.bf16.msra.mxu1 %v1334_v24  ;;  %914 = vmatprep.subr.bf16.mxu0 %v1318_v23  ;;  %v1364_v57 = vld [vmem:[#allocation7 + $0x98] ss:$12 sps:$4 sm:$0xff]   ;;  %v1367_v59 = vld [vmem:[#allocation7 + $0x170] ss:$12 sps:$4 sm:$0xff]   ;;  %v1368_v60 = vld [vmem:[#allocation7 + $0x168] ss:$12 sps:$4 sm:$0xff]  }
  0x4a   :  { %1235 = vmatprep.subr.bf16.mxu1 %v1337_v27  ;;  %v1365_v58 = vld [vmem:[#allocation7 + $0x16c] ss:$12 sps:$4 sm:$0xff]   ;;  %v1369_v61 = vld [vmem:[#allocation7 + $0xb0] ss:$12 sps:$4 sm:$0xff]   ;;  %v1373_v63 = vld [vmem:[#allocation7 + $0x248] ss:$12 sps:$4 sm:$0xff]  }
  0x4b   :  { %v1372_v62 = vld [vmem:[#allocation7 + $0x184] ss:$12 sps:$4 sm:$0xff]   ;;  %v80_v1 = vshrl.u32 %v79_v0, 7  ;;  %v77_v3 = vld [vmem:[%s1635_s2] sm:$0xf] }
  0x4c   :  { %915 = vmatpush1.bf16.msra.mxu0 %v1320_v25  ;;  %v1370_v25 = vld [vmem:[#allocation7 + $0x180] ss:$12 sps:$4 sm:$0xff]   ;;  %v1404_v0 = vld [vmem:[#allocation7 + $0x218] ss:$12 sps:$4 sm:$0xff]  }
  0x4d   :  { %1236 = vmatpush3.bf16.msra.mxu1 %v1339_v28  ;;  %916 = vmatprep.subr.bf16.mxu0 %v1321_v26  ;;  %v1596_v2 = vsub.s32 0, %v80_v1  ;;  %v1601_v4 = vsub.s32 1, %v80_v1  ;;  %v1605_v10 = vsub.s32 2, %v80_v1  ;;  %v93_v13 = vsub.s32 3, %v80_v1  ;;  %v1374_v26 = vld [vmem:[#allocation7 + $0x188] ss:$12 sps:$4 sm:$0xff]  }
  0x4e   :  { %1237 = vmatprep.subr.bf16.mxu1 %v1342_v30  ;;  %v1377_v28 = vld [vmem:[#allocation7 + $0x19c] ss:$12 sps:$4 sm:$0xff]   ;;  %v1407_v1 = vld [vmem:[#allocation7 + $0x22c] ss:$12 sps:$4 sm:$0xff]  }
  0x4f   :  { %v82_v5 = vrot.slane %v77_v3, %v1596_v2  ;;  %v86_v6 = vrot.slane %v77_v3, %v1601_v4  ;;  %v90_v19 = vrot.slane %v77_v3, %v1605_v10  ;;  %v94_v22 = vrot.slane %v77_v3, %v93_v13  ;;  %v1408_v3 = vld [vmem:[#allocation7 + $0x2f0] ss:$12 sps:$4 sm:$0xff]  }
  0x50   :  { %917 = vmatpush1.bf16.msra.mxu0 %v1323_v29  ;;  %v1378_v29 = vld [vmem:[#allocation7 + $0x260] ss:$12 sps:$4 sm:$0xff]   ;;  %v1416_v13 = vld [vmem:[#allocation7 + $0x270] ss:$12 sps:$4 sm:$0xff]  }
  0x51   :  { %1238 = vmatpush3.bf16.msra.mxu1 %v1344_v31  ;;  %918 = vmatprep.subr.bf16.mxu0 %v1324_v32 }
  0x52   :  { %1239 = vmatprep.subr.bf16.mxu1 %v1347_v33 }
  0x54   :  { %919 = vmatpush1.bf16.msra.mxu0 %v1326_v34 }
  0x55   :  { %1240 = vmatpush3.bf16.msra.mxu1 %v1349_v35  ;;  %920 = vmatprep.subr.bf16.mxu0 %v1327_v36 }
  0x56   :  { %1241 = vmatprep.subr.bf16.mxu1 %v1352_v37  ;;  %v1375_v37 = vld [vmem:[#allocation7 + $0x198] ss:$12 sps:$4 sm:$0xff]  }
  0x58   :  { %921 = vmatpush1.bf16.msra.mxu0 %v1329_v38  ;;  %v1379_v38 = vld [vmem:[#allocation7 + $0x1a0] ss:$12 sps:$4 sm:$0xff]  }
  0x59   :  { %1242 = vmatpush3.bf16.msra.mxu1 %v1354_v39  ;;  %922 = vmatprep.subr.bf16.mxu0 %v1330_v40 }
  0x5a   :  { %1243 = vmatprep.subr.bf16.mxu1 %v1357_v41  ;;  %v1382_v41 = vld [vmem:[#allocation7 + $0x1b4] ss:$12 sps:$4 sm:$0xff]  }
  0x5c   :  { %923 = vmatpush1.bf16.msra.mxu0 %v1333_v42  ;;  %v1383_v42 = vld [vmem:[#allocation7 + $0x278] ss:$12 sps:$4 sm:$0xff]  }
  0x5d   :  { %1244 = vmatpush3.bf16.msra.mxu1 %v1359_v44  ;;  %924 = vmatprep.subr.bf16.mxu0 %v1335_v43 }
  0x5e   :  { %1245 = vmatprep.subr.bf16.mxu1 %v1362_v55  ;;  %v1390_v55 = vld [vmem:[#allocation7 + $0x1e0] ss:$12 sps:$4 sm:$0xff]  }
  0x60   :  { %925 = vmatpush1.bf16.msra.mxu0 %v1338_v45 }
  0x61   :  { %926 = vmatprep.subr.bf16.mxu0 %v1340_v46  ;;  %1246 = vmatpush3.bf16.msra.mxu1 %v1364_v57  ;;  %v1380_v46 = vld [vmem:[#allocation7 + $0x1b0] ss:$12 sps:$4 sm:$0xff]  }
  0x62   :  { %1247 = vmatprep.subr.bf16.mxu1 %v1367_v59  ;;  %v1397_v57 = vld [vmem:[#allocation7 + $0x1fc] ss:$12 sps:$4 sm:$0xff]   ;;  %v1395_v59 = vld [vmem:[#allocation7 + $0x1f8] ss:$12 sps:$4 sm:$0xff]  }
  0x64   :  { %927 = vmatpush1.bf16.msra.mxu0 %v1343_v47  ;;  %v1384_v47 = vld [vmem:[#allocation7 + $0x1b8] ss:$12 sps:$4 sm:$0xff]  }
  0x65   :  { %928 = vmatprep.subr.bf16.mxu0 %v1345_v48  ;;  %1248 = vmatpush3.bf16.msra.mxu1 %v1369_v61  ;;  %v1402_v61 = vld [vmem:[#allocation7 + $0x214] ss:$12 sps:$4 sm:$0xff]  }
  0x66   :  { %1255 = vmatprep.subr.bf16.mxu1 %v1373_v63  ;;  %v1400_v63 = vld [vmem:[#allocation7 + $0x210] ss:$12 sps:$4 sm:$0xff]  }
  0x68   :  { %929 = vmatpush1.bf16.msra.mxu0 %v1348_v49  ;;  %v1387_v49 = vld [vmem:[#allocation7 + $0x1cc] ss:$12 sps:$4 sm:$0xff]  }
  0x69   :  { %930 = vmatprep.subr.bf16.mxu0 %v1350_v50  ;;  %v1388_v50 = vld [vmem:[#allocation7 + $0x290] ss:$12 sps:$4 sm:$0xff]  }
  0x6c   :  { %931 = vmatpush1.bf16.msra.mxu0 %v1353_v51  ;;  %v1385_v51 = vld [vmem:[#allocation7 + $0x1c8] ss:$12 sps:$4 sm:$0xff]  }
  0x6d   :  { %932 = vmatprep.subr.bf16.mxu0 %v1355_v52  ;;  %v1389_v52 = vld [vmem:[#allocation7 + $0x1d0] ss:$12 sps:$4 sm:$0xff]  }
  0x70   :  { %933 = vmatpush1.bf16.msra.mxu0 %v1358_v53  ;;  %v1392_v53 = vld [vmem:[#allocation7 + $0x1e4] ss:$12 sps:$4 sm:$0xff]  }
  0x71   :  { %934 = vmatprep.subr.bf16.mxu0 %v1360_v54  ;;  %v1393_v54 = vld [vmem:[#allocation7 + $0x2a8] ss:$12 sps:$4 sm:$0xff]  }
  0x74   :  { %935 = vmatpush1.bf16.msra.mxu0 %v1363_v56  ;;  %v1394_v56 = vld [vmem:[#allocation7 + $0x1e8] ss:$12 sps:$4 sm:$0xff]  }
  0x75   :  { %936 = vmatprep.subr.bf16.mxu0 %v1365_v58  ;;  %v1398_v58 = vld [vmem:[#allocation7 + $0x2c0] ss:$12 sps:$4 sm:$0xff]  }
  0x78   :  { %937 = vmatpush1.bf16.msra.mxu0 %v1368_v60  ;;  %v1399_v60 = vld [vmem:[#allocation7 + $0x200] ss:$12 sps:$4 sm:$0xff]  }
  0x79   :  { %949 = vmatprep.subr.bf16.mxu0 %v1372_v62  ;;  %v1403_v62 = vld [vmem:[#allocation7 + $0x2d8] ss:$12 sps:$4 sm:$0xff]  }
 0x113   :  { %v185_v7 = vpop.f32.mrb[0].mxu1 }
 0x114   :  { %v186_v8 = vadd.f32 %v185_v7, %v82_v5  ;;  %v187_v9 = vpop.f32.mrb[1].mxu1  ;;  %v1412_v7 = vld [vmem:[#allocation7 + $0x244] ss:$12 sps:$4 sm:$0xff]  }
 0x115   :  { %v188_v11 = vadd.f32 %v187_v9, %v86_v6  ;;  %v189_v12 = vpop.f32.mrb[2].mxu1  ;;  %v1415_v9 = vld [vmem:[#allocation7 + $0x25c] ss:$12 sps:$4 sm:$0xff]  }
 0x116   :  { %v190_v14 = vadd.f32 %v189_v12, %v82_v5  ;;  %v191_v15 = vpop.f32.mrb[3].mxu1  ;;  %v237_v17 = vmax.f32 %v186_v8, 0.0  ;;  %v1405_v5 = vld [vmem:[#allocation7 + $0x228] ss:$12 sps:$4 sm:$0xff]   ;;  %v1410_v8 = vld [vmem:[#allocation7 + $0x240] ss:$12 sps:$4 sm:$0xff]  }
 0x117   :  { %v192_v16 = vadd.f32 %v191_v15, %v86_v6  ;;  %v238_v20 = vmax.f32 %v188_v11, 0.0  ;;  %v1409_v6 = vld [vmem:[#allocation7 + $0x230] ss:$12 sps:$4 sm:$0xff]   ;;  %v1413_v11 = vld [vmem:[#allocation7 + $0x258] ss:$12 sps:$4 sm:$0xff]  }
 0x118   :  { %v241_v18 = vmax.f32 %v190_v14, 0.0  ;;  %v1418_v12 = vld [vmem:[#allocation7 + $0x274] ss:$12 sps:$4 sm:$0xff]   ;;  %v1421_v14 = vld [vmem:[#allocation7 + $0x28c] ss:$12 sps:$4 sm:$0xff]  }
 0x119   :  { %v242_v21 = vmax.f32 %v192_v16, 0.0  ;;  %v1419_v15 = vld [vmem:[#allocation7 + $0x288] ss:$12 sps:$4 sm:$0xff]   ;;  %v1424_v16 = vld [vmem:[#allocation7 + $0x2a4] ss:$12 sps:$4 sm:$0xff]  }
 0x11a   :  { %v245_v23 = vpack.c.bf16 %v241_v18, %v237_v17  ;;  %v1422_v17 = vld [vmem:[#allocation7 + $0x2a0] ss:$12 sps:$4 sm:$0xff]   ;;  %v1427_v18 = vld [vmem:[#allocation7 + $0x2bc] ss:$12 sps:$4 sm:$0xff]  }
 0x11b   :  { %v246_v24 = vpack.c.bf16 %v242_v21, %v238_v20  ;;  %v228_v27 = vpop.f32.mrb[4].mxu1  ;;  %v1430_v20 = vld [vmem:[#allocation7 + $0x2d4] ss:$12 sps:$4 sm:$0xff]   ;;  %v1428_v21 = vld [vmem:[#allocation7 + $0x2d0] ss:$12 sps:$4 sm:$0xff]  }
 0x11c   :  { %v229_v30 = vadd.f32 %v228_v27, %v90_v19  ;;  %v230_v31 = vpop.f32.mrb[5].mxu1 }
 0x11d   :  { %938 = vmatprep.mubr.bf16.mxu0 %v246_v24  ;;  %1024 = vmatprep.mubr.bf16.mxu1 %v246_v24  ;;  %v231_v32 = vadd.f32 %v230_v31, %v94_v22  ;;  %v232_v33 = vpop.f32.mrb[6].mxu1 }
 0x11e   :  { %939 = vmatmul.mubr.bf16.vlgmr.msra.gmra.mrb[0].mxu0 %v245_v23  ;;  %1025 = vmatmul.mubr.bf16.vlgmr.msra.gmra.mrb[8].mxu1 %v245_v23  ;;  %v239_v34 = vmax.f32 %v229_v30, 0.0  ;;  %v233_v35 = vadd.f32 %v232_v33, %v90_v19  ;;  %v234_v36 = vpop.f32.mrb[7].mxu1  ;;  %v1425_v19 = vld [vmem:[#allocation7 + $0x2b8] ss:$12 sps:$4 sm:$0xff]   ;;  %v1431_v23 = vld [vmem:[#allocation7 + $0x2e8] ss:$12 sps:$4 sm:$0xff]  }
 0x11f   :  { %950 = vmatpush1.bf16.msra.mxu0 %v1370_v25  ;;  %1256 = vmatpush3.bf16.msra.mxu1 %v1374_v26  ;;  %v240_v39 = vmax.f32 %v231_v32, 0.0  ;;  %v235_v40 = vadd.f32 %v234_v36, %v94_v22  ;;  %v1433_v22 = vld [vmem:[#allocation7 + $0x2ec] ss:$12 sps:$4 sm:$0xff]   ;;  %v377_v30 = vld [vmem:[%s1637_s4] sm:$0x7] }
 0x120   :  { %951 = vmatprep.subr.bf16.mxu0 %v1377_v28  ;;  %1257 = vmatprep.subr.bf16.mxu1 %v1378_v29  ;;  %v243_v43 = vmax.f32 %v233_v35, 0.0  ;;  %v390_v31 = vrot.slane %v377_v30, %v1605_v10 }
 0x121   :  { %v244_v44 = vmax.f32 %v235_v40, 0.0 }
 0x122   :  { %v1608_v45 = vpack.c.bf16 %v243_v43, %v239_v34  ;;  %v386_v43 = vrot.slane %v377_v30, %v1601_v4 }
 0x123   :  { %952 = vmatpush1.bf16.msra.mxu0 %v1375_v37  ;;  %1258 = vmatpush3.bf16.msra.mxu1 %v1379_v38  ;;  %v248_v48 = vpack.c.bf16 %v244_v44, %v240_v39 }
 0x124   :  { %953 = vmatprep.subr.bf16.mxu0 %v1382_v41  ;;  %1259 = vmatprep.subr.bf16.mxu1 %v1383_v42  ;;  %v382_v42 = vrot.slane %v377_v30, %v1596_v2 }
 0x125   :  { %1065 = vmatprep.mubr.bf16.mxu1 %v248_v48  ;;  %981 = vmatprep.mubr.bf16.mxu0 %v248_v48 }
 0x127   :  { %954 = vmatpush1.bf16.msra.mxu0 %v1380_v46  ;;  %1260 = vmatpush3.bf16.msra.mxu1 %v1384_v47 }
 0x128   :  { %955 = vmatprep.subr.bf16.mxu0 %v1387_v49  ;;  %1261 = vmatprep.subr.bf16.mxu1 %v1388_v50 }
 0x12b   :  { %956 = vmatpush1.bf16.msra.mxu0 %v1385_v51  ;;  %1262 = vmatpush3.bf16.msra.mxu1 %v1389_v52 }
 0x12c   :  { %957 = vmatprep.subr.bf16.mxu0 %v1392_v53  ;;  %1263 = vmatprep.subr.bf16.mxu1 %v1393_v54 }
 0x12f   :  { %958 = vmatpush1.bf16.msra.mxu0 %v1390_v55  ;;  %1264 = vmatpush3.bf16.msra.mxu1 %v1394_v56 }
 0x130   :  { %959 = vmatprep.subr.bf16.mxu0 %v1397_v57  ;;  %1265 = vmatprep.subr.bf16.mxu1 %v1398_v58 }
 0x133   :  { %960 = vmatpush1.bf16.msra.mxu0 %v1395_v59  ;;  %1266 = vmatpush3.bf16.msra.mxu1 %v1399_v60 }
 0x134   :  { %961 = vmatprep.subr.bf16.mxu0 %v1402_v61  ;;  %1267 = vmatprep.subr.bf16.mxu1 %v1403_v62 }
 0x137   :  { %962 = vmatpush1.bf16.msra.mxu0 %v1400_v63  ;;  %1268 = vmatpush3.bf16.msra.mxu1 %v1404_v0 }
 0x138   :  { %963 = vmatprep.subr.bf16.mxu0 %v1407_v1  ;;  %1269 = vmatprep.subr.bf16.mxu1 %v1408_v3 }
 0x13b   :  { %964 = vmatpush1.bf16.msra.mxu0 %v1405_v5  ;;  %1270 = vmatpush3.bf16.msra.mxu1 %v1409_v6 }
 0x13c   :  { %965 = vmatprep.subr.bf16.mxu0 %v1412_v7 }
 0x13e   :  { %1066 = vmatmul.mubr.bf16.vlgmr.msra.gmra.mrb[12].mxu1 %v1608_v45 }
 0x13f   :  { %966 = vmatpush1.bf16.msra.mxu0 %v1410_v8  ;;  %v1112_v8 = vstv %s1639_s6 }
 0x140   :  { %967 = vmatprep.subr.bf16.mxu0 %v1415_v9 }
 0x143   :  { %968 = vmatpush1.bf16.msra.mxu0 %v1413_v11 }
 0x144   :  { %969 = vmatprep.subr.bf16.mxu0 %v1418_v12 }
 0x147   :  { %970 = vmatpush1.bf16.msra.mxu0 %v1416_v13 }
 0x148   :  { %971 = vmatprep.subr.bf16.mxu0 %v1421_v14 }
 0x14b   :  { %972 = vmatpush1.bf16.msra.mxu0 %v1419_v15 }
 0x14c   :  { %973 = vmatprep.subr.bf16.mxu0 %v1424_v16 }
 0x14f   :  { %974 = vmatpush1.bf16.msra.mxu0 %v1422_v17 }
 0x150   :  { %975 = vmatprep.subr.bf16.mxu0 %v1427_v18 }
 0x153   :  { %976 = vmatpush1.bf16.msra.mxu0 %v1425_v19 }
 0x154   :  { %977 = vmatprep.subr.bf16.mxu0 %v1430_v20 }
 0x157   :  { %978 = vmatpush1.bf16.msra.mxu0 %v1428_v21 }
 0x158   :  { %979 = vmatprep.subr.bf16.mxu0 %v1433_v22 }
 0x15b   :  { %980 = vmatpush1.bf16.msra.mxu0 %v1431_v23 }
 0x15e   :  { %982 = vmatmul.mubr.bf16.vlgmr.msra.gmra.mrb[0].mxu0 %v1608_v45  ;;  %v1080_v45 = vld [vmem:[%s1638_s5] sm:$0x7] }
 0x15f   :  { %v1085_v47 = vrot.slane %v1080_v45, %v1596_v2  ;;  %v1089_v50 = vrot.slane %v1080_v45, %v1601_v4  ;;  %v1093_v58 = vrot.slane %v1080_v45, %v1605_v10 }
 0x1f1   :  { %v1249_v24 = vpop.f32.mrb[8].mxu1 }
 0x1f2   :  { %v1250_v25 = vpop.f32.mrb[9].mxu1 }
 0x1f3   :  { %v1251_v26 = vadd.f32 %v1250_v25, %v1249_v24  ;;  %v1252_v27 = vpop.f32.mrb[10].mxu1 }
 0x1f4   :  { %v1253_v28 = vpop.f32.mrb[11].mxu1 }
 0x1f5   :  { %v1254_v29 = vadd.f32 %v1253_v28, %v1252_v27  ;;  %v1027_v34 = vadd.f32 %v1251_v26, %v390_v31 }
 0x1f7   :  { %v1030_v38 = vadd.f32 %v1254_v29, %v390_v31 }
 0x211   :  { %v1271_v32 = vpop.f32.mrb[12].mxu1 }
 0x212   :  { %v1272_v33 = vpop.f32.mrb[13].mxu1 }
 0x213   :  { %v1273_v35 = vadd.f32 %v1272_v33, %v1271_v32  ;;  %v1274_v36 = vpop.f32.mrb[14].mxu1 }
 0x214   :  { %v1275_v37 = vpop.f32.mrb[15].mxu1 }
 0x215   :  { %v1068_v39 = vadd.f32 %v1273_v35, %v1027_v34  ;;  %v1276_v40 = vadd.f32 %v1275_v37, %v1274_v36 }
 0x217   :  { %v1071_v41 = vadd.f32 %v1276_v40, %v1030_v38  ;;  %v1076_v55 = vmax.f32 %v1068_v39, 0.0 }
 0x219   :  { %v1079_v61 = vmax.f32 %v1071_v41, 0.0  ;;  %v1099_v1 = vmul.f32 %v1093_v58, %v1076_v55 }
 0x21b   :  { %v1102_v4 = vmul.f32 %v1093_v58, %v1079_v61 }
 0x231   :  { %v983_v44 = vpop.f32.mrb[0].mxu0 }
 0x232   :  { %v1277_v46 = vadd.f32 %v983_v44, %v382_v42  ;;  %v985_v48 = vpop.f32.mrb[1].mxu0 }
 0x233   :  { %v1278_v49 = vadd.f32 %v985_v48, %v386_v43  ;;  %v987_v51 = vpop.f32.mrb[2].mxu0 }
 0x234   :  { %v1074_v52 = vmax.f32 %v1277_v46, 0.0  ;;  %v1279_v53 = vadd.f32 %v987_v51, %v382_v42  ;;  %v989_v54 = vpop.f32.mrb[3].mxu0 }
 0x235   :  { %v1075_v56 = vmax.f32 %v1278_v49, 0.0  ;;  %v1280_v57 = vadd.f32 %v989_v54, %v386_v43 }
 0x236   :  { %v1097_v59 = vmul.f32 %v1085_v47, %v1074_v52  ;;  %v1077_v60 = vmax.f32 %v1279_v53, 0.0 }
 0x237   :  { %v1098_v62 = vmul.f32 %v1089_v50, %v1075_v56  ;;  %v1078_v63 = vmax.f32 %v1280_v57, 0.0 }
 0x238   :  { %v1100_v0 = vmul.f32 %v1085_v47, %v1077_v60 }
 0x239   :  { %v1101_v2 = vmul.f32 %v1089_v50, %v1078_v63  ;;  %v1103_v3 = vadd.f32 %v1098_v62, %v1097_v59 }
 0x23b   :  { %v1104_v5 = vadd.f32 %v1103_v3, %v1099_v1  ;;  %v1107_v6 = vadd.f32 %v1101_v2, %v1100_v0 }
 0x23d   :  { %1105 = vadd.xlane.f32.xlu0 %v1104_v5  ;;  %v1108_v7 = vadd.f32 %v1107_v6, %v1102_v4 }
 0x241   :  { %1109 = vadd.xlane.f32.xlu0 %v1108_v7 }
 0x2ca   :  { %v1106_v10 = vpop.xlane.xlu0 %1105 }
 0x2cb   :  { %v1113_v9 = vadd.f32 %v1112_v8, %v1106_v10 }
 0x2cd   :  { %1116 = vst.msk [vmem:[%s1640_s7] sm:$0xff] %vm1115_vm2, %v1113_v9 }
 0x2ce   :  { %v1110_v11 = vpop.xlane.xlu0 %1109 }
 0x2cf   :  { %v1114_v12 = vadd.f32 %v1112_v8, %v1110_v11 }
 0x2d1   :  { %1117 = vst.msk [vmem:[%s1640_s7 + $0x8] sm:$0xff] %vm1115_vm2, %v1114_v12 }
 0x2d2   :  { %1122 = vsyncpa [#allocation4], 1 }
 0x2d3   :  { %1123 = vsyncpa [#allocation6], 1 }

</bundles_post_ra>
